<compile_context>
chip_gen: v6e
topology: v6e:2x2x1
jax: 0.10.0
libtpu: 0.0.40
codegen_flags: <defaults>
</compile_context>

<pallas_src>
import functools

import jax
import jax.numpy as jnp
from jax.experimental import pallas as pl
from jax.experimental.pallas import tpu as pltpu

BN_EPS = 1e-5
TB = 512  # lane-tile (batch) size; multiple of 128


def _disc_kernel(x_ref, vec_ref, wt_ref, out_ref, *, num_layers):
    """One batch tile, lane-dense: x_ref is [C, TB] (C on sublanes, batch on lanes)."""
    x = x_ref[...].astype(jnp.float32)          # [C, TB]
    vecs = vec_ref[...]                         # [L, C, 3] = (scale, shift, bias)
    for l in range(num_layers):                 # static unroll (L = 3)
        scale = vecs[l, :, 0:1]                 # [C, 1] broadcast along lanes
        shift = vecs[l, :, 1:2]
        bias = vecs[l, :, 2:3]
        h = jnp.maximum(x * scale + shift, 0.0)  # folded BN + ReLU
        # Dropout(p=0.01) is the identity in eval mode.
        x = jnp.dot(wt_ref[l], h, preferred_element_type=jnp.float32) + bias
    out_ref[...] = x.astype(out_ref.dtype)


def init_params(key, latentchannels=10, hiddenchannels=10, numlayers=3):
    """Deterministic synthetic parameters mirroring the PyTorch __init__ shapes."""
    fc = [latentchannels] + [hiddenchannels] * numlayers + [1]
    raw = []
    for idx in range(numlayers):
        c_in, c_out = fc[idx], fc[idx + 1]
        key, kg, kb, km, kv, kw, kc = jax.random.split(key, 7)
        gamma = 1.0 + 0.1 * jax.random.normal(kg, (c_in,), jnp.float32)
        beta = 0.1 * jax.random.normal(kb, (c_in,), jnp.float32)
        mean = 0.1 * jax.random.normal(km, (c_in,), jnp.float32)
        var = jnp.abs(1.0 + 0.1 * jax.random.normal(kv, (c_in,), jnp.float32))
        bound = 1.0 / (c_in ** 0.5)  # PyTorch Linear default init
        w = jax.random.uniform(kw, (c_in, c_out), jnp.float32, -bound, bound)
        bias = jax.random.uniform(kc, (c_out,), jnp.float32, -bound, bound)
        raw.append((gamma, beta, mean, var, w, bias))
    return raw


def pack_params(raw_params):
    """Fold BN into scale/shift and pack params into two contiguous slabs.

    Assumes a uniform channel count across layers (true for the default
    latentchannels == hiddenchannels config, where the final '1' channel of the
    PyTorch module is never instantiated).
    """
    vec_rows, wts = [], []
    for gamma, beta, mean, var, w, bias in raw_params:
        scale = gamma * jax.lax.rsqrt(var + BN_EPS)
        shift = beta - mean * scale
        vec_rows.append(jnp.stack([scale, shift, bias], axis=-1))  # [C, 3]
        wts.append(w.T)                                            # [C_out, C_in]
    return jnp.stack(vec_rows), jnp.stack(wts)  # [L, C, 3], [L, C, C]


@jax.jit
def discriminator_forward(z, vec_slab, wt_slab):
    n, c = z.shape
    num_layers, c_out, _ = wt_slab.shape
    n_pad = max(TB, pl.cdiv(n, TB) * TB)

    # Lane-dense layout: batch on the 128-lane axis, padded to a whole tile.
    zt = jnp.pad(z.T.astype(jnp.float32), ((0, 0), (0, n_pad - n)))  # [C, n_pad]

    out_t = pl.pallas_call(
        functools.partial(_disc_kernel, num_layers=num_layers),
        out_shape=jax.ShapeDtypeStruct((c_out, n_pad), jnp.float32),
        grid=(n_pad // TB,),
        in_specs=[
            pl.BlockSpec((c, TB), lambda i: (0, i)),            # activations: tiled
            pl.BlockSpec(vec_slab.shape, lambda i: (0, 0, 0)),  # params: resident
            pl.BlockSpec(wt_slab.shape, lambda i: (0, 0, 0)),   # params: resident
        ],
        out_specs=pl.BlockSpec((c_out, TB), lambda i: (0, i)),
        compiler_params=pltpu.CompilerParams(
            dimension_semantics=("parallel",),
        ),
    )(zt, vec_slab, wt_slab)

    return out_t[:, :n].T  # back to [N, C_out]


def discriminator_reference(z, raw_params):
    """Plain-JAX reference (unfused BN) for validation."""
    x = z.astype(jnp.float32)
    for gamma, beta, mean, var, w, bias in raw_params:
        x = (x - mean) * jax.lax.rsqrt(var + BN_EPS) * gamma + beta
        x = jnp.maximum(x, 0.0)
        x = x @ w + bias
    return x


if __name__ == "__main__":
    key = jax.random.PRNGKey(0)
    k_z, k_p = jax.random.split(key)

    N, LATENT = 8, 10
    z = jax.random.normal(k_z, (N, LATENT), jnp.float32)
    raw = init_params(k_p, latentchannels=LATENT, hiddenchannels=10, numlayers=3)
    vec_slab, wt_slab = pack_params(raw)

    out = jax.block_until_ready(discriminator_forward(z, vec_slab, wt_slab))
    ref = discriminator_reference(z, raw)

    assert out.shape == (N, 10), out.shape
    max_err = float(jnp.max(jnp.abs(out - ref)))
    assert max_err < 1e-4, f"mismatch: max abs err {max_err}"
    print("KERNEL_OK")
</pallas_src>

<mosaic_0001>
module attributes {stable_mosaic.version = 11 : i64} {
  func.func @_disc_kernel(%arg0: i32, %arg1: memref<10x512xf32, #tpu.memory_space<vmem>>, %arg2: memref<3x10x3xf32, #tpu.memory_space<vmem>>, %arg3: memref<3x10x10xf32, #tpu.memory_space<vmem>>, %arg4: memref<10x512xf32, #tpu.memory_space<vmem>>) attributes {dimension_semantics = [#tpu.dimension_semantics<parallel>], iteration_bounds = array<i64: 1>, scalar_prefetch = 0 : i64, scratch_operands = 0 : i64, tpu.core_type = #tpu.core_type<tc>, window_params = [{transform_indices = @transform_0, window_bounds = array<i64: 10, 512>}, {pipeline_mode = #tpu.pipeline_mode<synchronous>, transform_indices = @transform_1, window_bounds = array<i64: 3, 10, 3>}, {pipeline_mode = #tpu.pipeline_mode<synchronous>, transform_indices = @transform_2, window_bounds = array<i64: 3, 10, 10>}, {transform_indices = @transform_3, window_bounds = array<i64: 10, 512>}]} {
    %c0 = arith.constant 0 : index
    %c0_0 = arith.constant 0 : index
    %0 = vector.load %arg1[%c0, %c0_0] : memref<10x512xf32, #tpu.memory_space<vmem>>, vector<10x512xf32>
    %c0_1 = arith.constant 0 : index
    %c0_2 = arith.constant 0 : index
    %c0_3 = arith.constant 0 : index
    %1 = vector.load %arg2[%c0_1, %c0_2, %c0_3] : memref<3x10x3xf32, #tpu.memory_space<vmem>>, vector<3x10x3xf32>
    %2 = vector.extract_strided_slice %1 {offsets = [0, 0, 0], sizes = [1, 10, 1], strides = [1, 1, 1]} : vector<3x10x3xf32> to vector<1x10x1xf32>
    %3 = vector.shape_cast %2 : vector<1x10x1xf32> to vector<10x1xf32>
    %4 = vector.extract_strided_slice %1 {offsets = [0, 0, 1], sizes = [1, 10, 1], strides = [1, 1, 1]} : vector<3x10x3xf32> to vector<1x10x1xf32>
    %5 = vector.shape_cast %4 : vector<1x10x1xf32> to vector<10x1xf32>
    %6 = vector.extract_strided_slice %1 {offsets = [0, 0, 2], sizes = [1, 10, 1], strides = [1, 1, 1]} : vector<3x10x3xf32> to vector<1x10x1xf32>
    %7 = vector.shape_cast %6 : vector<1x10x1xf32> to vector<10x1xf32>
    %8 = vector.broadcast %3 : vector<10x1xf32> to vector<10x512xf32>
    %9 = arith.mulf %0, %8 : vector<10x512xf32>
    %10 = vector.broadcast %5 : vector<10x1xf32> to vector<10x512xf32>
    %11 = arith.addf %9, %10 : vector<10x512xf32>
    %cst = arith.constant 0.000000e+00 : f32
    %12 = vector.broadcast %cst : f32 to vector<10x512xf32>
    %13 = arith.maximumf %11, %12 : vector<10x512xf32>
    %c0_4 = arith.constant 0 : index
    %c0_5 = arith.constant 0 : index
    %c0_6 = arith.constant 0 : index
    %14 = vector.load %arg3[%c0_4, %c0_5, %c0_6] : memref<3x10x10xf32, #tpu.memory_space<vmem>>, vector<1x10x10xf32>
    %15 = vector.shape_cast %14 : vector<1x10x10xf32> to vector<10x10xf32>
    %cst_7 = arith.constant dense<0.000000e+00> : vector<10x512xf32>
    %16 = tpu.matmul %15, %13, %cst_7 {dimension_numbers = #tpu.dot_dimension_numbers<[1], [0], [0], [1], [0, 0, 1, 1], [], []>} : vector<10x10xf32>, vector<10x512xf32>, vector<10x512xf32> -> vector<10x512xf32>
    %17 = vector.broadcast %7 : vector<10x1xf32> to vector<10x512xf32>
    %18 = arith.addf %16, %17 : vector<10x512xf32>
    %19 = vector.extract_strided_slice %1 {offsets = [1, 0, 0], sizes = [1, 10, 1], strides = [1, 1, 1]} : vector<3x10x3xf32> to vector<1x10x1xf32>
    %20 = vector.shape_cast %19 : vector<1x10x1xf32> to vector<10x1xf32>
    %21 = vector.extract_strided_slice %1 {offsets = [1, 0, 1], sizes = [1, 10, 1], strides = [1, 1, 1]} : vector<3x10x3xf32> to vector<1x10x1xf32>
    %22 = vector.shape_cast %21 : vector<1x10x1xf32> to vector<10x1xf32>
    %23 = vector.extract_strided_slice %1 {offsets = [1, 0, 2], sizes = [1, 10, 1], strides = [1, 1, 1]} : vector<3x10x3xf32> to vector<1x10x1xf32>
    %24 = vector.shape_cast %23 : vector<1x10x1xf32> to vector<10x1xf32>
    %25 = vector.broadcast %20 : vector<10x1xf32> to vector<10x512xf32>
    %26 = arith.mulf %18, %25 : vector<10x512xf32>
    %27 = vector.broadcast %22 : vector<10x1xf32> to vector<10x512xf32>
    %28 = arith.addf %26, %27 : vector<10x512xf32>
    %cst_8 = arith.constant 0.000000e+00 : f32
    %29 = vector.broadcast %cst_8 : f32 to vector<10x512xf32>
    %30 = arith.maximumf %28, %29 : vector<10x512xf32>
    %c1 = arith.constant 1 : index
    %c0_9 = arith.constant 0 : index
    %c0_10 = arith.constant 0 : index
    %31 = vector.load %arg3[%c1, %c0_9, %c0_10] : memref<3x10x10xf32, #tpu.memory_space<vmem>>, vector<1x10x10xf32>
    %32 = vector.shape_cast %31 : vector<1x10x10xf32> to vector<10x10xf32>
    %cst_11 = arith.constant dense<0.000000e+00> : vector<10x512xf32>
    %33 = tpu.matmul %32, %30, %cst_11 {dimension_numbers = #tpu.dot_dimension_numbers<[1], [0], [0], [1], [0, 0, 1, 1], [], []>} : vector<10x10xf32>, vector<10x512xf32>, vector<10x512xf32> -> vector<10x512xf32>
    %34 = vector.broadcast %24 : vector<10x1xf32> to vector<10x512xf32>
    %35 = arith.addf %33, %34 : vector<10x512xf32>
    %36 = vector.extract_strided_slice %1 {offsets = [2, 0, 0], sizes = [1, 10, 1], strides = [1, 1, 1]} : vector<3x10x3xf32> to vector<1x10x1xf32>
    %37 = vector.shape_cast %36 : vector<1x10x1xf32> to vector<10x1xf32>
    %38 = vector.extract_strided_slice %1 {offsets = [2, 0, 1], sizes = [1, 10, 1], strides = [1, 1, 1]} : vector<3x10x3xf32> to vector<1x10x1xf32>
    %39 = vector.shape_cast %38 : vector<1x10x1xf32> to vector<10x1xf32>
    %40 = vector.extract_strided_slice %1 {offsets = [2, 0, 2], sizes = [1, 10, 1], strides = [1, 1, 1]} : vector<3x10x3xf32> to vector<1x10x1xf32>
    %41 = vector.shape_cast %40 : vector<1x10x1xf32> to vector<10x1xf32>
    %42 = vector.broadcast %37 : vector<10x1xf32> to vector<10x512xf32>
    %43 = arith.mulf %35, %42 : vector<10x512xf32>
    %44 = vector.broadcast %39 : vector<10x1xf32> to vector<10x512xf32>
    %45 = arith.addf %43, %44 : vector<10x512xf32>
    %cst_12 = arith.constant 0.000000e+00 : f32
    %46 = vector.broadcast %cst_12 : f32 to vector<10x512xf32>
    %47 = arith.maximumf %45, %46 : vector<10x512xf32>
    %c2 = arith.constant 2 : index
    %c0_13 = arith.constant 0 : index
    %c0_14 = arith.constant 0 : index
    %48 = vector.load %arg3[%c2, %c0_13, %c0_14] : memref<3x10x10xf32, #tpu.memory_space<vmem>>, vector<1x10x10xf32>
    %49 = vector.shape_cast %48 : vector<1x10x10xf32> to vector<10x10xf32>
    %cst_15 = arith.constant dense<0.000000e+00> : vector<10x512xf32>
    %50 = tpu.matmul %49, %47, %cst_15 {dimension_numbers = #tpu.dot_dimension_numbers<[1], [0], [0], [1], [0, 0, 1, 1], [], []>} : vector<10x10xf32>, vector<10x512xf32>, vector<10x512xf32> -> vector<10x512xf32>
    %51 = vector.broadcast %41 : vector<10x1xf32> to vector<10x512xf32>
    %52 = arith.addf %50, %51 : vector<10x512xf32>
    %c0_16 = arith.constant 0 : index
    %c0_17 = arith.constant 0 : index
    %53 = vector.load %arg4[%c0_16, %c0_17] : memref<10x512xf32, #tpu.memory_space<vmem>>, vector<10x512xf32>
    tpu.vector_store %arg4[%c0_16, %c0_17], %52 {strides = array<i32>} : memref<10x512xf32, #tpu.memory_space<vmem>>, vector<10x512xf32>,
    return
  }
  func.func @transform_0(%arg0: i32) -> (i32, i32) {
    %c0_i32 = arith.constant 0 : i32
    %c0_i32_0 = arith.constant 0 : i32
    return %c0_i32, %arg0 : i32, i32
  }
  func.func @transform_1(%arg0: i32) -> (i32, i32, i32) {
    %c0_i32 = arith.constant 0 : i32
    %c0_i32_0 = arith.constant 0 : i32
    %c0_i32_1 = arith.constant 0 : i32
    %c0_i32_2 = arith.constant 0 : i32
    return %c0_i32, %c0_i32_0, %c0_i32_1 : i32, i32, i32
  }
  func.func @transform_2(%arg0: i32) -> (i32, i32, i32) {
    %c0_i32 = arith.constant 0 : i32
    %c0_i32_0 = arith.constant 0 : i32
    %c0_i32_1 = arith.constant 0 : i32
    %c0_i32_2 = arith.constant 0 : i32
    return %c0_i32, %c0_i32_0, %c0_i32_1 : i32, i32, i32
  }
  func.func @transform_3(%arg0: i32) -> (i32, i32) {
    %c0_i32 = arith.constant 0 : i32
    %c0_i32_0 = arith.constant 0 : i32
    return %c0_i32, %arg0 : i32, i32
  }
}

</mosaic_0001>

<bundles_post_ra>
// kernel: discriminator_forward.1
= control target key start
LH: loop header
LB: loop body
LE: loop exit
PB: predicated region body
PF: predicated region fallthrough
CT: control target
= control target key end

     0   :  { %v762_v0 = vmov 1   ;;  %v763_v1 = vmov 0   ;;  %v764_v4 = vmov 0.0   ;;  %v765_v5 = vmov 2   ;;  %s915_s1 = inlined_call_operand.vmem [shape: f32[3,10,3], index: 1, kind: input, shape index: {}]   ;;  %s916_s0 = inlined_call_operand.vmem [shape: f32[10,512], index: 0, kind: input, shape index: {}]   ;;  %s917_s2 = inlined_call_operand.vmem [shape: f32[3,10,10], index: 2, kind: input, shape index: {}]   ;;  %s918_s3 = inlined_call_operand.vmem [shape: f32[10,512], index: 3, kind: output, shape index: {}]  }
   0x1   :  { %749 = vset.pattern.permute.xlu1 %v762_v0  ;;  %748 = vset.pattern.permute.xlu0 %v763_v1  ;;  %v23_v2 = vld [vmem:[%s915_s1 + $0x8] sm:$0x3]  ;;  %v22_v3 = vld [vmem:[%s915_s1] sm:$0xff]  ;;  %v25_v6 = vld [vmem:[%s915_s1 + $0x18] sm:$0x3]  ;;  %vm87_vm0 = vcmask 1041408  }
   0x2   :  { %51 = vperm.xlu1 %749, %v23_v2   ;;  %35 = vperm.xlu0 %748, %v23_v2   ;;  %v24_v7 = vld [vmem:[%s915_s1 + $0x10] sm:$0xff]  ;;  %v18_v8 = vld [vmem:[%s916_s0 + $0x20] sm:$0x3]  ;;  %v19_v10 = vld [vmem:[%s916_s0 + $0x28] sm:$0x3]  ;;  %vm80_vm1 = vcmask 80896  }
   0x3   :  { %164 = vmatprep.mubr.f32.mxu0 %v764_v4  ;;  %241 = vmatprep.mubr.f32.mxu1 %v764_v4  ;;  %v20_v9 = vld [vmem:[%s916_s0 + $0x30] sm:$0x3]  ;;  %v21_v11 = vld [vmem:[%s916_s0 + $0x38] sm:$0x3]  ;;  %v14_v16 = vld [vmem:[%s916_s0] sm:$0xff] }
   0x4   :  { %v15_v19 = vld [vmem:[%s916_s0 + $0x8] sm:$0xff]  ;;  %v16_v20 = vld [vmem:[%s916_s0 + $0x10] sm:$0xff]  ;;  %v17_v21 = vld [vmem:[%s916_s0 + $0x18] sm:$0xff] }
   0x5   :  { %v70_v44 = vld [vmem:[%s917_s2] sm:$0xff]  ;;  %v71_v45 = vld [vmem:[%s917_s2 + $0x8] sm:$0x3] }
   0x6   :  { %47 = vperm.xlu1 %749, %v22_v3   ;;  %30 = vperm.xlu0 %748, %v22_v3   ;;  %v27_v46 = vld [vmem:[%s915_s1 + $0x28] sm:$0x3]  ;;  %v26_v47 = vld [vmem:[%s915_s1 + $0x20] sm:$0xff] }
   0xa   :  { %751 = vset.pattern.permute.xlu1 %v765_v5  ;;  %750 = vset.pattern.permute.xlu0 %v765_v5 }
   0xb   :  { %73 = vperm.xlu1 %751, %v22_v3   ;;  %77 = vperm.xlu0 %750, %v23_v2  }
   0xf   :  { %752 = vset.pattern.permute.xlu1 %v763_v1  ;;  %753 = vset.pattern.permute.xlu0 %v763_v1 }
  0x10   :  { %261 = vperm.xlu1 %752, %v25_v6   ;;  %256 = vperm.xlu0 %753, %v24_v7  }
  0x14   :  { %754 = vset.pattern.permute.xlu1 %v762_v0  ;;  %755 = vset.pattern.permute.xlu0 %v765_v5 }
  0x15   :  { %277 = vperm.xlu1 %754, %v25_v6   ;;  %304 = vperm.xlu0 %755, %v25_v6  }
  0x19   :  { %273 = vperm.xlu1 %754, %v24_v7   ;;  %758 = vset.pattern.permute.xlu0 %v763_v1 }
  0x1a   :  { %481 = vperm.xlu0 %758, %v26_v47  }
  0x1d   :  { %756 = vset.pattern.permute.xlu1 %v765_v5 }
  0x1e   :  { %300 = vperm.xlu1 %756, %v24_v7   ;;  %760 = vset.pattern.permute.xlu0 %v765_v5 }
  0x1f   :  { %525 = vperm.xlu0 %760, %v26_v47  }
  0x22   :  { %757 = vset.pattern.permute.xlu1 %v763_v1 }
  0x23   :  { %486 = vperm.xlu1 %757, %v27_v46  }
  0x27   :  { %759 = vset.pattern.permute.xlu1 %v762_v0 }
  0x28   :  { %502 = vperm.xlu1 %759, %v27_v46  }
  0x2c   :  { %498 = vperm.xlu1 %759, %v26_v47  }
  0x30   :  { %761 = vset.pattern.permute.xlu1 %v765_v5 }
  0x31   :  { %529 = vperm.xlu1 %761, %v27_v46  }
  0x7d   :  { %v52_v12 = vpop.permute.xlu1 %51  ;;  %v36_v13 = vpop.permute.xlu0 %35 }
  0x7e   :  { %v42_v14 = vmul.f32 %v36_v13, %v18_v8  ;;  %v44_v15 = vmul.f32 %v36_v13, %v20_v9  ;;  %v43_v17 = vmul.f32 %v36_v13, %v19_v10  ;;  %v45_v18 = vmul.f32 %v36_v13, %v21_v11 }
  0x80   :  { %v59_v22 = vadd.f32 %v52_v12, %v43_v17  ;;  %v61_v23 = vadd.f32 %v52_v12, %v45_v18  ;;  %v58_v24 = vadd.f32 %v52_v12, %v42_v14  ;;  %v60_v25 = vadd.f32 %v52_v12, %v44_v15 }
  0x81   :  { %v31_v26 = vpop.permute.xlu0 %30  ;;  %v48_v31 = vpop.permute.xlu1 %47 }
  0x82   :  { %v38_v27 = vmul.f32 %v31_v26, %v14_v16  ;;  %v39_v28 = vmul.f32 %v31_v26, %v15_v19  ;;  %v40_v29 = vmul.f32 %v31_v26, %v16_v20  ;;  %v41_v30 = vmul.f32 %v31_v26, %v17_v21 }
  0x83   :  { %v67_v32 = vmax.f32 %v59_v22, 0.0  ;;  %v69_v33 = vmax.f32 %v61_v23, 0.0  ;;  %v66_v34 = vmax.f32 %v58_v24, 0.0  ;;  %v68_v35 = vmax.f32 %v60_v25, 0.0 }
  0x84   :  { %v55_v36 = vadd.f32 %v48_v31, %v39_v28  ;;  %v57_v37 = vadd.f32 %v48_v31, %v41_v30  ;;  %v54_v38 = vadd.f32 %v48_v31, %v38_v27  ;;  %v56_v39 = vadd.f32 %v48_v31, %v40_v29  ;;  %v724_v31 = vld [vmem:[%s917_s2 + $0x10] sm:$0xff] }
  0x85   :  { %716 = vmatprep.subr.msk.mxu0 %vm87_vm0, %v67_v32  ;;  %720 = vmatprep.subr.msk.mxu1 %vm87_vm0, %v69_v33  ;;  %v725_v32 = vld [vmem:[%s917_s2 + $0x18] sm:$0x3] }
  0x86   :  { %717 = vmatpush1.msk.msra.mxu0 %vm87_vm0, %v66_v34  ;;  %721 = vmatpush1.msk.msra.mxu1 %vm87_vm0, %v68_v35  ;;  %v63_v40 = vmax.f32 %v55_v36, 0.0  ;;  %v65_v41 = vmax.f32 %v57_v37, 0.0  ;;  %v62_v42 = vmax.f32 %v54_v38, 0.0  ;;  %v64_v43 = vmax.f32 %v56_v39, 0.0  ;;  %v74_v48 = vpop.permute.xlu1 %73  ;;  %v78_v50 = vpop.permute.xlu0 %77 }
  0x88   :  { %130 = vmatprep.subr.mxu0 %v63_v40  ;;  %207 = vmatprep.subr.mxu1 %v65_v41 }
  0x89   :  { %131 = vmatpush1.msra.mxu0 %v62_v42  ;;  %208 = vmatpush1.msra.mxu1 %v64_v43 }
  0x8a   :  { %718 = vmatmul.mubr.msk.f32.vlgmr.msra.gmra.mxu0 %vm80_vm1, %v70_v44  ;;  %722 = vmatmul.mubr.msk.f32.vlgmr.msra.gmra.mxu1 %vm80_vm1, %v70_v44 }
  0x8b   :  { %170 = vmatprep.mubr.f32.mxu0 %v764_v4  ;;  %247 = vmatprep.mubr.f32.mxu1 %v764_v4  ;;  %v262_v49 = vpop.permute.xlu1 %261  ;;  %v257_v62 = vpop.permute.xlu0 %256 }
  0x8e   :  { %719 = vmatmul.mubr.msk.f32.gmra.mxu0 %vm80_vm1, %v71_v45  ;;  %723 = vmatmul.mubr.msk.f32.gmra.mxu1 %vm80_vm1, %v71_v45 }
  0x8f   :  { %389 = vmatprep.mubr.f32.mxu0 %v764_v4  ;;  %466 = vmatprep.mubr.f32.mxu1 %v764_v4 }
  0x90   :  { %v278_v55 = vpop.permute.xlu1 %277  ;;  %v305_v35 = vpop.permute.xlu0 %304 }
  0x94   :  { %v274_v12 = vpop.permute.xlu1 %273 }
  0x95   :  { %v482_v47 = vpop.permute.xlu0 %481 }
  0x99   :  { %v301_v33 = vpop.permute.xlu1 %300 }
  0x9e   :  { %v487_v34 = vpop.permute.xlu1 %486 }
  0xa3   :  { %v503_v40 = vpop.permute.xlu1 %502 }
 0x14a   :  { %v166_v51 = vpop.f32.mrf.mxu0  ;;  %v243_v52 = vpop.f32.mrf.mxu1 }
 0x14b   :  { %v167_v58 = vadd.f32 %v166_v51, %v74_v48  ;;  %v244_v59 = vadd.f32 %v243_v52, %v74_v48 }
 0x14c   :  { %v168_v53 = vpop.f32.mrf.mxu0  ;;  %v245_v54 = vpop.f32.mrf.mxu1 }
 0x14d   :  { %v169_v56 = vadd.f32 %v168_v53, %v74_v48  ;;  %v246_v57 = vadd.f32 %v245_v54, %v74_v48  ;;  %v264_v8 = vmul.f32 %v257_v62, %v167_v58  ;;  %v266_v9 = vmul.f32 %v257_v62, %v244_v59 }
 0x14e   :  { %v172_v60 = vpop.f32.mrf.mxu0  ;;  %v249_v61 = vpop.f32.mrf.mxu1 }
 0x14f   :  { %v173_v63 = vadd.f32 %v172_v60, %v78_v50  ;;  %v250_v0 = vadd.f32 %v249_v61, %v78_v50  ;;  %v265_v3 = vmul.f32 %v257_v62, %v169_v56  ;;  %v267_v5 = vmul.f32 %v257_v62, %v246_v57  ;;  %v499_v60 = vpop.permute.xlu1 %498 }
 0x150   :  { %v174_v1 = vpop.f32.mrf.mxu0  ;;  %v251_v2 = vpop.f32.mrf.mxu1  ;;  %v280_v21 = vadd.f32 %v274_v12, %v264_v8  ;;  %v282_v22 = vadd.f32 %v274_v12, %v266_v9 }
 0x151   :  { %v175_v6 = vadd.f32 %v174_v1, %v78_v50  ;;  %v252_v7 = vadd.f32 %v251_v2, %v78_v50  ;;  %v268_v10 = vmul.f32 %v262_v49, %v173_v63  ;;  %v270_v11 = vmul.f32 %v262_v49, %v250_v0 }
 0x152   :  { %v281_v19 = vadd.f32 %v274_v12, %v265_v3  ;;  %v283_v20 = vadd.f32 %v274_v12, %v267_v5  ;;  %v288_v29 = vmax.f32 %v280_v21, 0.0  ;;  %v290_v30 = vmax.f32 %v282_v22, 0.0 }
 0x153   :  { %v269_v13 = vmul.f32 %v262_v49, %v175_v6  ;;  %v271_v14 = vmul.f32 %v262_v49, %v252_v7  ;;  %v284_v15 = vadd.f32 %v278_v55, %v268_v10  ;;  %v286_v16 = vadd.f32 %v278_v55, %v270_v11 }
 0x154   :  { %v289_v27 = vmax.f32 %v281_v19, 0.0  ;;  %v291_v28 = vmax.f32 %v283_v20, 0.0 }
 0x155   :  { %v285_v17 = vadd.f32 %v278_v55, %v269_v13  ;;  %v287_v18 = vadd.f32 %v278_v55, %v271_v14  ;;  %v292_v25 = vmax.f32 %v284_v15, 0.0  ;;  %v294_v26 = vmax.f32 %v286_v16, 0.0  ;;  %v734_v16 = vld [vmem:[%s917_s2 + $0x20] sm:$0xff] }
 0x157   :  { %v293_v23 = vmax.f32 %v285_v17, 0.0  ;;  %v295_v24 = vmax.f32 %v287_v18, 0.0  ;;  %v735_v17 = vld [vmem:[%s917_s2 + $0x28] sm:$0x3]  ;;  %v526_v18 = vpop.permute.xlu0 %525 }
 0x159   :  { %726 = vmatprep.subr.msk.mxu0 %vm87_vm0, %v293_v23  ;;  %730 = vmatprep.subr.msk.mxu1 %vm87_vm0, %v295_v24  ;;  %v530_v23 = vpop.permute.xlu1 %529 }
 0x15a   :  { %727 = vmatpush1.msk.msra.mxu0 %vm87_vm0, %v292_v25  ;;  %731 = vmatpush1.msk.msra.mxu1 %vm87_vm0, %v294_v26 }
 0x15b   :  { %355 = vmatprep.subr.mxu0 %v289_v27  ;;  %432 = vmatprep.subr.mxu1 %v291_v28 }
 0x15c   :  { %356 = vmatpush1.msra.mxu0 %v288_v29  ;;  %433 = vmatpush1.msra.mxu1 %v290_v30 }
 0x15d   :  { %728 = vmatmul.mubr.msk.f32.vlgmr.msra.gmra.mxu0 %vm80_vm1, %v724_v31  ;;  %732 = vmatmul.mubr.msk.f32.vlgmr.msra.gmra.mxu1 %vm80_vm1, %v724_v31 }
 0x15e   :  { %395 = vmatprep.mubr.f32.mxu0 %v764_v4  ;;  %472 = vmatprep.mubr.f32.mxu1 %v764_v4 }
 0x161   :  { %729 = vmatmul.mubr.msk.f32.gmra.mxu0 %vm80_vm1, %v725_v32  ;;  %733 = vmatmul.mubr.msk.f32.gmra.mxu1 %vm80_vm1, %v725_v32 }
 0x162   :  { %614 = vmatprep.mubr.f32.mxu0 %v764_v4  ;;  %691 = vmatprep.mubr.f32.mxu1 %v764_v4 }
 0x21d   :  { %v391_v36 = vpop.f32.mrf.mxu0  ;;  %v468_v37 = vpop.f32.mrf.mxu1 }
 0x21e   :  { %v392_v43 = vadd.f32 %v391_v36, %v301_v33  ;;  %v469_v44 = vadd.f32 %v468_v37, %v301_v33 }
 0x21f   :  { %v393_v38 = vpop.f32.mrf.mxu0  ;;  %v470_v39 = vpop.f32.mrf.mxu1 }
 0x220   :  { %v394_v41 = vadd.f32 %v393_v38, %v301_v33  ;;  %v471_v42 = vadd.f32 %v470_v39, %v301_v33  ;;  %v489_v56 = vmul.f32 %v482_v47, %v392_v43  ;;  %v491_v57 = vmul.f32 %v482_v47, %v469_v44 }
 0x221   :  { %v397_v45 = vpop.f32.mrf.mxu0  ;;  %v474_v46 = vpop.f32.mrf.mxu1 }
 0x222   :  { %v398_v48 = vadd.f32 %v397_v45, %v305_v35  ;;  %v475_v49 = vadd.f32 %v474_v46, %v305_v35  ;;  %v490_v52 = vmul.f32 %v482_v47, %v394_v41  ;;  %v492_v53 = vmul.f32 %v482_v47, %v471_v42 }
 0x223   :  { %v399_v50 = vpop.f32.mrf.mxu0  ;;  %v476_v51 = vpop.f32.mrf.mxu1  ;;  %v505_v6 = vadd.f32 %v499_v60, %v489_v56  ;;  %v507_v7 = vadd.f32 %v499_v60, %v491_v57 }
 0x224   :  { %v400_v54 = vadd.f32 %v399_v50, %v305_v35  ;;  %v477_v55 = vadd.f32 %v476_v51, %v305_v35  ;;  %v493_v58 = vmul.f32 %v487_v34, %v398_v48  ;;  %v495_v59 = vmul.f32 %v487_v34, %v475_v49 }
 0x225   :  { %v506_v3 = vadd.f32 %v499_v60, %v490_v52  ;;  %v508_v5 = vadd.f32 %v499_v60, %v492_v53  ;;  %v513_v14 = vmax.f32 %v505_v6, 0.0  ;;  %v515_v15 = vmax.f32 %v507_v7, 0.0 }
 0x226   :  { %v494_v61 = vmul.f32 %v487_v34, %v400_v54  ;;  %v496_v62 = vmul.f32 %v487_v34, %v477_v55  ;;  %v509_v63 = vadd.f32 %v503_v40, %v493_v58  ;;  %v511_v0 = vadd.f32 %v503_v40, %v495_v59 }
 0x227   :  { %v514_v12 = vmax.f32 %v506_v3, 0.0  ;;  %v516_v13 = vmax.f32 %v508_v5, 0.0 }
 0x228   :  { %v510_v1 = vadd.f32 %v503_v40, %v494_v61  ;;  %v512_v2 = vadd.f32 %v503_v40, %v496_v62  ;;  %v517_v10 = vmax.f32 %v509_v63, 0.0  ;;  %v519_v11 = vmax.f32 %v511_v0, 0.0 }
 0x22a   :  { %v518_v8 = vmax.f32 %v510_v1, 0.0  ;;  %v520_v9 = vmax.f32 %v512_v2, 0.0 }
 0x22c   :  { %736 = vmatprep.subr.msk.mxu0 %vm87_vm0, %v518_v8  ;;  %740 = vmatprep.subr.msk.mxu1 %vm87_vm0, %v520_v9 }
 0x22d   :  { %737 = vmatpush1.msk.msra.mxu0 %vm87_vm0, %v517_v10  ;;  %741 = vmatpush1.msk.msra.mxu1 %vm87_vm0, %v519_v11 }
 0x22e   :  { %580 = vmatprep.subr.mxu0 %v514_v12  ;;  %657 = vmatprep.subr.mxu1 %v516_v13 }
 0x22f   :  { %581 = vmatpush1.msra.mxu0 %v513_v14  ;;  %658 = vmatpush1.msra.mxu1 %v515_v15 }
 0x230   :  { %738 = vmatmul.mubr.msk.f32.vlgmr.msra.gmra.mxu0 %vm80_vm1, %v734_v16  ;;  %742 = vmatmul.mubr.msk.f32.vlgmr.msra.gmra.mxu1 %vm80_vm1, %v734_v16 }
 0x231   :  { %620 = vmatprep.mubr.f32.mxu0 %v764_v4  ;;  %697 = vmatprep.mubr.f32.mxu1 %v764_v4 }
 0x234   :  { %739 = vmatmul.mubr.msk.f32.gmra.mxu0 %vm80_vm1, %v735_v17  ;;  %743 = vmatmul.mubr.msk.f32.gmra.mxu1 %vm80_vm1, %v735_v17 }
 0x2f0   :  { %v616_v19 = vpop.f32.mrf.mxu0  ;;  %v693_v20 = vpop.f32.mrf.mxu1 }
 0x2f1   :  { %v617_v21 = vadd.f32 %v616_v19, %v526_v18  ;;  %v694_v22 = vadd.f32 %v693_v20, %v526_v18 }
 0x2f2   :  { %v618_v24 = vpop.f32.mrf.mxu0  ;;  %v695_v25 = vpop.f32.mrf.mxu1 }
 0x2f3   :  { %704 = vst [vmem:[%s918_s3] sm:$0xff] %v617_v21  ;;  %706 = vst [vmem:[%s918_s3 + $0x10] sm:$0xff] %v694_v22  ;;  %v619_v4 = vadd.f32 %v618_v24, %v526_v18  ;;  %v696_v26 = vadd.f32 %v695_v25, %v526_v18 }
 0x2f4   :  { %v622_v27 = vpop.f32.mrf.mxu0  ;;  %v699_v28 = vpop.f32.mrf.mxu1 }
 0x2f5   :  { %705 = vst [vmem:[%s918_s3 + $0x8] sm:$0xff] %v619_v4  ;;  %707 = vst [vmem:[%s918_s3 + $0x18] sm:$0xff] %v696_v26  ;;  %v623_v29 = vadd.f32 %v622_v27, %v530_v23  ;;  %v700_v30 = vadd.f32 %v699_v28, %v530_v23 }
 0x2f6   :  { %v624_v31 = vpop.f32.mrf.mxu0  ;;  %v701_v32 = vpop.f32.mrf.mxu1 }
 0x2f7   :  { %708 = vst [vmem:[%s918_s3 + $0x20] sm:$0x3] %v623_v29  ;;  %710 = vst [vmem:[%s918_s3 + $0x30] sm:$0x3] %v700_v30  ;;  %v625_v33 = vadd.f32 %v624_v31, %v530_v23  ;;  %v702_v34 = vadd.f32 %v701_v32, %v530_v23 }
 0x2f9   :  { %709 = vst [vmem:[%s918_s3 + $0x28] sm:$0x3] %v625_v33  ;;  %711 = vst [vmem:[%s918_s3 + $0x38] sm:$0x3] %v702_v34 }

</bundles_post_ra>
